<compile_context>
chip_gen: v7x
topology: tpu7x:2x2x1
jax: 0.10.0
libtpu: 0.0.40
codegen_flags: <defaults>
</compile_context>

<pallas_src>
import jax
import jax.numpy as jnp
from jax.experimental import pallas as pl
from jax.experimental.pallas import tpu as pltpu


def _identity2d_kernel(x_ref, s_ref, o_ref):
    # x_ref: (TM, TN) tile of the flattened (N*C, H*W) input.
    # s_ref: (TM, 1) per-row scale (= weight_mask * weight for the row's
    #        channel); broadcasts across the lane dimension.
    o_ref[...] = (x_ref[...] * s_ref[...]).astype(o_ref.dtype)


def _round_up(x, m):
    return ((x + m - 1) // m) * m


def _sublane_align(dtype):
    # Sub-32-bit dtypes pack along sublanes: 16 rows/vreg for 2-byte types,
    # 32 rows/vreg for 1-byte types.
    itemsize = jnp.dtype(dtype).itemsize
    if itemsize >= 4:
        return 8
    if itemsize == 2:
        return 16
    return 32


def _pick_tiles(rows, cols, dtype):
    """Pick (tm, tn, vmem_limit_bytes) for a lane-dense (rows, cols) slab."""
    itemsize = jnp.dtype(dtype).itemsize
    sub = _sublane_align(dtype)

    # Generation-aware VMEM capacity (v5e/v6e: 128 MiB, v7x: 64 MiB per TC).
    try:
        vmem_cap = int(getattr(pltpu.get_tpu_info(), "vmem_capacity_bytes",
                               64 << 20))
    except Exception:
        vmem_cap = 64 << 20  # conservative (v7x-sized)

    # Per tile-buffer budget.  Double-buffered footprint ~= 4x this
    # (input + output tiles, 2 buffers each) plus the tiny scale buffers.
    per_buffer = (6 << 20) if vmem_cap <= (64 << 20) else (8 << 20)
    max_elems = per_buffer // itemsize

    # Prefer full-width rows: tn == cols means one contiguous DMA per step.
    if cols <= max_elems // sub:
        tn = cols
    else:
        tn = max(128, min(8192, (max_elems // sub // 128) * 128))

    tm = max(sub, (max_elems // max(tn, 1) // sub) * sub)
    tm = min(tm, _round_up(rows, sub))

    # Keep at least ~4 grid steps when possible so a 2-TC chip (v7x) can
    # shard the "parallel" grid axes across both TensorCores.
    while (pl.cdiv(rows, tm) * pl.cdiv(cols, tn)) < 4 and tm > sub:
        tm = max(sub, ((tm // 2) // sub) * sub)

    # Explicit scoped-VMEM request: double-buffered x/out tiles + padded
    # (tm, 1) scale buffers + headroom; clamped below physical VMEM.
    tile_bytes = tm * tn * itemsize
    scale_bytes = _round_up(tm, sub) * 128 * itemsize  # (tm,1) pads to 128 lanes
    vmem_limit = 4 * tile_bytes + 4 * scale_bytes + (4 << 20)
    vmem_limit = max(vmem_limit, 32 << 20)
    vmem_limit = min(vmem_limit, (3 * vmem_cap) // 4)

    return tm, tn, int(vmem_limit)


def identity2d(x, weight, weight_mask):
    """x: (N, C, H, W); weight, weight_mask: (C, 1, 1). Returns x * (mask * weight)."""
    N, C, H, W = x.shape
    rows, cols = N * C, H * W

    # Fuse mask * weight once in the wrapper (touches only C elements), then
    # expand to one scale per flattened row (row = n * C + c -> channel c).
    w_eff = (weight_mask * weight).reshape(C).astype(x.dtype)
    scale = jnp.broadcast_to(w_eff, (N, C)).reshape(rows, 1)

    x2 = x.reshape(rows, cols)  # lane-dense 2D view; free for contiguous NCHW

    tm, tn, vmem_limit = _pick_tiles(rows, cols, x.dtype)
    grid = (pl.cdiv(rows, tm), pl.cdiv(cols, tn))  # ragged last blocks clipped

    out2 = pl.pallas_call(
        _identity2d_kernel,
        out_shape=jax.ShapeDtypeStruct((rows, cols), x.dtype),
        grid_spec=pltpu.PrefetchScalarGridSpec(
            num_scalar_prefetch=0,
            grid=grid,
            in_specs=[
                pl.BlockSpec((tm, tn), lambda i, j: (i, j)),
                # NOTE: j (cols) is the inner grid axis, so this block index
                # does not change across consecutive steps and the scale stays
                # resident in VMEM instead of being re-fetched every step.
                pl.BlockSpec((tm, 1), lambda i, j: (i, 0)),
            ],
            out_specs=pl.BlockSpec((tm, tn), lambda i, j: (i, j)),
        ),
        compiler_params=pltpu.CompilerParams(
            dimension_semantics=("parallel", "parallel"),
            vmem_limit_bytes=vmem_limit,
        ),
        # input_output_aliases={0: 0} would halve peak HBM allocation when the
        # caller donates x; omitted so the caller can keep x alive.
    )(x2, scale)

    return out2.reshape(N, C, H, W)


if __name__ == "__main__":
    key = jax.random.PRNGKey(0)
    N, C, H, W = 2, 4, 16, 16

    x = jax.random.normal(key, (N, C, H, W), dtype=jnp.float32)

    # Deterministic parameters matching Identity2d.reset_parameters (ones) and
    # the registered ones-buffer weight_mask.
    weight = jnp.ones((C, 1, 1), dtype=jnp.float32)
    weight_mask = jnp.ones((C, 1, 1), dtype=jnp.float32)

    out = identity2d(x, weight, weight_mask)
    out = jax.block_until_ready(out)

    # Reference check (pure JAX, same broadcast semantics as PyTorch).
    ref = x * (weight_mask * weight)  # (C,1,1) broadcasts against (N,C,H,W)
    assert out.shape == x.shape and out.dtype == x.dtype
    assert jnp.allclose(out, ref, atol=0, rtol=0)

    print("KERNEL_OK")
</pallas_src>

<mosaic_0001>
module attributes {stable_mosaic.version = 11 : i64} {
  func.func @_identity2d_kernel(%arg0: i32, %arg1: i32, %arg2: memref<8x256xf32, #tpu.memory_space<vmem>>, %arg3: memref<8x1xf32, #tpu.memory_space<vmem>>, %arg4: memref<8x256xf32, #tpu.memory_space<vmem>>) attributes {dimension_semantics = [#tpu.dimension_semantics<parallel>, #tpu.dimension_semantics<parallel>], iteration_bounds = array<i64: 1, 1>, scalar_prefetch = 0 : i64, scratch_operands = 0 : i64, tpu.core_type = #tpu.core_type<tc>, window_params = [{transform_indices = @transform_0, window_bounds = array<i64: 8, 256>}, {transform_indices = @transform_1, window_bounds = array<i64: 8, 1>}, {transform_indices = @transform_2, window_bounds = array<i64: 8, 256>}]} {
    %c0 = arith.constant 0 : index
    %c0_0 = arith.constant 0 : index
    %0 = vector.load %arg2[%c0, %c0_0] : memref<8x256xf32, #tpu.memory_space<vmem>>, vector<8x256xf32>
    %c0_1 = arith.constant 0 : index
    %c0_2 = arith.constant 0 : index
    %1 = vector.load %arg3[%c0_1, %c0_2] : memref<8x1xf32, #tpu.memory_space<vmem>>, vector<8x1xf32>
    %2 = vector.broadcast %1 : vector<8x1xf32> to vector<8x256xf32>
    %3 = arith.mulf %0, %2 : vector<8x256xf32>
    %c0_3 = arith.constant 0 : index
    %c0_4 = arith.constant 0 : index
    %4 = vector.load %arg4[%c0_3, %c0_4] : memref<8x256xf32, #tpu.memory_space<vmem>>, vector<8x256xf32>
    tpu.vector_store %arg4[%c0_3, %c0_4], %3 {strides = array<i32>} : memref<8x256xf32, #tpu.memory_space<vmem>>, vector<8x256xf32>,
    return
  }
  func.func @transform_0(%arg0: i32, %arg1: i32) -> (i32, i32) {
    %c0_i32 = arith.constant 0 : i32
    return %arg0, %arg1 : i32, i32
  }
  func.func @transform_1(%arg0: i32, %arg1: i32) -> (i32, i32) {
    %c0_i32 = arith.constant 0 : i32
    %c0_i32_0 = arith.constant 0 : i32
    return %arg0, %c0_i32 : i32, i32
  }
  func.func @transform_2(%arg0: i32, %arg1: i32) -> (i32, i32) {
    %c0_i32 = arith.constant 0 : i32
    return %arg0, %arg1 : i32, i32
  }
}

</mosaic_0001>

<bundles_post_ra>
// kernel: tpu_custom_call.1
= control target key start
LH: loop header
LB: loop body
LE: loop exit
PB: predicated region body
PF: predicated region fallthrough
CT: control target
= control target key end

     0   :  { %7 = vsyncpa [#allocation3], 0  ;;  %s148_s0 = inlined_call_operand.hbm [shape: f32[8,256], index: 0, kind: input, shape index: {}]   ;;  %s149_s1 = inlined_call_operand.vmem [shape: f32[8,1], index: 1, kind: input, shape index: {}]   ;;  %s150_s2 = inlined_call_operand.hbm [shape: f32[8,256], index: 2, kind: output, shape index: {}]  }
   0x1   :  { %8 = vsyncpa [#allocation4], 0  ;;  %s103_s9 = smov [#allocation2]   ;;  %s55_s13 = scalar_lea.hbm %s148_s0, 256 }
   0x2   :  { %s15_s10 = sshll.u32 %s103_s9, 4  ;;  %p56_p0 = scmp.ne.s32.totalorder %s148_s0, %s55_s13  ;;  %s16_s10 = int_to_ptr.vmem [resolvable:$true] %s15_s10 }
   0x3   :  { %p59_p1 = scmp.lt.u32.totalorder %s55_s13, %s148_s0 }
   0x5   :  { %p61_p2 = pnand %p59_p1, %p56_p0 }
   0x7   :  { %64 = shalt.err (!%p61_p2)
}
   0x8   :  { %s65_s18 = scalar_lea.vmem %s16_s10, 256  ;;  %p70_p4 = scmp.lt.s32.totalorder %s16_s10, %s16_s10 }
   0x9   :  { %p66_p3 = scmp.ne.s32.totalorder %s16_s10, %s65_s18  ;;  %p71_p5 = scmp.lt.s32.totalorder %s65_s18, %s65_s18 }
   0xb   :  { %p72_p6 = por %p71_p5, %p70_p4 }
   0xd   :  { %p73_p7 = pnand %p72_p6, %p66_p3 }
   0xf   :  { %76 = shalt.err (!%p73_p7)
}
  0x10   :  { %18 = dma.hbm_to_vmem [thread:$0]  %s148_s0, 256, %s16_s10, [#allocation3]  }
  0x11   :  { %99 = dma.done.wait [#allocation3], 256  }
  0x12   :  { %100 = vsyncadd [#allocation3], 4294967040  ;;  %v104_v0 = vmov 0   ;;  %v26_v1 = vld [vmem:[%s149_s1] sm:$0xff]  ;;  %v25_v3 = vld [vmem:[#allocation2 + $0x8] sm:$0xff]  ;;  %s105_s23 = smov [#allocation5]  }
  0x13   :  { %54 = vset.pattern.permute.xlu0 %v104_v0  ;;  %v24_v2 = vld [vmem:[#allocation2] sm:$0xff]  ;;  %s42_s24 = sshll.u32 %s105_s23, 4  ;;  %s43_s24 = int_to_ptr.vmem [resolvable:$true] %s42_s24 }
  0x14   :  { %29 = vperm.xlu0 %54, %v26_v1   ;;  %s77_s0 = scalar_lea.vmem %s43_s24, 256  ;;  %p82_p9 = scmp.lt.s32.totalorder %s43_s24, %s43_s24 }
  0x15   :  { %p78_p8 = scmp.ne.s32.totalorder %s43_s24, %s77_s0  ;;  %p83_p10 = scmp.lt.s32.totalorder %s77_s0, %s77_s0 }
  0x17   :  { %p84_p11 = por %p83_p10, %p82_p9 }
  0x19   :  { %p85_p12 = pnand %p84_p11, %p78_p8 }
  0x93   :  { %v30_v4 = vpop.permute.xlu0 %29 }
  0x94   :  { %v32_v5 = vmul.f32 %v30_v4, %v24_v2  ;;  %v33_v6 = vmul.f32 %v30_v4, %v25_v3 }
  0x96   :  { %34 = vst [vmem:[#allocation5] sm:$0xff] %v32_v5  ;;  %35 = vst [vmem:[#allocation5 + $0x8] sm:$0xff] %v33_v6 }
  0x97   :  { %88 = shalt.err (!%p85_p12)
}
  0x98   :  { %s89_s26 = scalar_lea.hbm %s150_s2, 256 }
  0x99   :  { %p90_p13 = scmp.ne.s32.totalorder %s150_s2, %s89_s26  ;;  %p93_p0 = scmp.lt.u32.totalorder %s89_s26, %s150_s2 }
  0x9b   :  { %p95_p1 = pnand %p93_p0, %p90_p13 }
  0x9d   :  { %98 = shalt.err (!%p95_p1)
}
  0x9e   :  { %45 = dma.vmem_to_hbm [thread:$0]  %s43_s24, 256, %s150_s2, [#allocation4]  }
  0x9f   :  { %101 = dma.done.wait [#allocation4], 256  }
  0xa0   :  { %102 = vsyncadd [#allocation4], 4294967040 }
  0xa1   :  { %49 = vsyncpa [#allocation3], 1 }
  0xa2   :  { %50 = vsyncpa [#allocation4], 1 }

</bundles_post_ra>
